<compile_context>
chip_gen: v6e
topology: v6e:2x2x1
jax: 0.10.0
libtpu: 0.0.40
codegen_flags: <defaults>
</compile_context>

<pallas_src>
import jax
import jax.numpy as jnp
from jax.experimental import pallas as pl
from jax.experimental.pallas import tpu as pltpu


def _critic_kernel(feat_ref, w1t_ref, b1_ref, w2_ref, avg_ref, b2_ref, out_ref):
    # feat_ref: (8, TB*P)    features, city axis lane-dense
    # w1t_ref:  (E, 8)       W1^T, zero-padded from 7 -> 8 input features
    # b1_ref:   (E, 1)
    # w2_ref:   (1, E)       second-layer weight row
    # avg_ref:  (TB*P, TB)   block averaging matrix: A[m, t] = 1/P iff m//P == t
    # b2_ref:   (1, 1)       SMEM scalar
    # out_ref:  (1, TB)      lane-dense per-problem Q means
    h = jnp.dot(w1t_ref[...], feat_ref[...],
                preferred_element_type=jnp.float32)            # (E, TB*P)
    h = jnp.maximum(h + b1_ref[...], 0.0)                      # ReLU (bias bcast)
    h_mean = jnp.dot(h, avg_ref[...],
                     preferred_element_type=jnp.float32)       # (E, TB)
    q = jnp.dot(w2_ref[...], h_mean,
                preferred_element_type=jnp.float32)            # (1, TB)
    out_ref[...] = q + b2_ref[0, 0]


def tsp_critic_forward(state, w1, b1, w2, b2, *, tb=128):
    """state: (N, P, 4) float32  ->  (N,) float32 (mean Q per problem)."""
    n, p, _ = state.shape
    e = w1.shape[1]

    # ---- XLA glue: gather tour order, roll neighbours -----------------------
    # Tour indices are stored as float32; exact for P < 2^24.
    idx = state[..., 0].astype(jnp.int32)                       # (N, P)
    coords = state[..., 1:3]                                    # (N, P, 2)
    temp = state[..., 3]                                        # (N, P)
    cg = jnp.take_along_axis(
        coords, jnp.broadcast_to(idx[..., None], coords.shape), axis=1)
    cp = jnp.roll(cg, 1, axis=1)
    cn = jnp.roll(cg, -1, axis=1)

    # Build features already transposed & 8-padded: rows = [gx,gy,px,py,nx,ny,T,0]
    feats_t = jnp.stack(
        [cg[..., 0], cg[..., 1], cp[..., 0], cp[..., 1],
         cn[..., 0], cn[..., 1], temp, jnp.zeros_like(temp)],
        axis=0).astype(jnp.float32)                             # (8, N, P)

    # Pad the problem axis up to a multiple of tb (padded problems are sliced off
    # at the end; they never mix with real problems in the per-problem mean).
    n_blocks = pl.cdiv(n, tb)
    n_pad = n_blocks * tb
    if n_pad != n:
        feats_t = jnp.pad(feats_t, ((0, 0), (0, n_pad - n), (0, 0)))
    m_blk = tb * p
    feats_t = feats_t.reshape(8, n_pad * p)                     # (8, M_total)

    # ---- packed weights ------------------------------------------------------
    w1t = jnp.zeros((e, 8), jnp.float32).at[:, :7].set(w1.T)    # (E, 8)
    b1c = b1.reshape(e, 1).astype(jnp.float32)                  # (E, 1)
    w2r = w2.reshape(1, e).astype(jnp.float32)                  # (1, E)
    b2s = b2.reshape(1, 1).astype(jnp.float32)                  # SMEM scalar

    # Constant block-averaging matrix (DMA'd once; block index never changes).
    avg = (jnp.arange(m_blk)[:, None] // p ==
           jnp.arange(tb)[None, :]).astype(jnp.float32) / p     # (TB*P, TB)

    out = pl.pallas_call(
        _critic_kernel,
        out_shape=jax.ShapeDtypeStruct((n_blocks, tb), jnp.float32),
        grid_spec=pltpu.PrefetchScalarGridSpec(
            num_scalar_prefetch=0,
            grid=(n_blocks,),
            in_specs=[
                pl.BlockSpec((8, m_blk), lambda i: (0, i)),      # features
                pl.BlockSpec((e, 8), lambda i: (0, 0)),          # W1^T (resident)
                pl.BlockSpec((e, 1), lambda i: (0, 0)),          # b1
                pl.BlockSpec((1, e), lambda i: (0, 0)),          # w2 row
                pl.BlockSpec((m_blk, tb), lambda i: (0, 0)),     # avg matrix
                pl.BlockSpec(memory_space=pltpu.MemorySpace.SMEM),  # b2 scalar
            ],
            out_specs=pl.BlockSpec((1, tb), lambda i: (i, 0)),   # lane-dense out
        ),
        compiler_params=pltpu.CompilerParams(
            dimension_semantics=("parallel",)),
    )(feats_t, w1t, b1c, w2r, avg, b2s)

    return out.reshape(-1)[:n]


def init_params(key, embed_dim):
    """Deterministic kaiming-uniform-style init (weights stored as (in, out))."""
    k1, k2 = jax.random.split(key)
    bound1 = float(jnp.sqrt(6.0 / 7.0))          # gain(sqrt(2)) * sqrt(3/fan_in)
    w1 = jax.random.uniform(k1, (7, embed_dim), jnp.float32, -bound1, bound1)
    b1 = jnp.full((1, embed_dim), 0.01, jnp.float32)
    bound2 = float(jnp.sqrt(6.0 / embed_dim))
    w2 = jax.random.uniform(k2, (embed_dim, 1), jnp.float32, -bound2, bound2)
    b2 = jnp.full((1, 1), 0.01, jnp.float32)
    return w1, b1, w2, b2


def _reference_forward(state, w1, b1, w2, b2):
    """Pure-JAX reference mirroring the PyTorch module (correctness check)."""
    x = state[..., :1]
    coords = state[..., 1:-1]
    temp = state[..., -1:]
    idx = jnp.broadcast_to(x.astype(jnp.int32), coords.shape)
    coords = jnp.take_along_axis(coords, idx, axis=1)
    feats = jnp.concatenate(
        [coords, jnp.roll(coords, 1, axis=1), jnp.roll(coords, -1, axis=1), temp], -1)
    h = jnp.maximum(feats @ w1 + b1[0], 0.0)
    q = (h @ w2 + b2[0, 0])[..., 0]
    return q.mean(axis=-1)


if __name__ == "__main__":
    key = jax.random.PRNGKey(0)
    k_perm, k_coord, k_temp, k_w = jax.random.split(key, 4)

    n_problems, problem_dim, embed_dim = 2, 8, 32

    # Build a valid TSP-style state: [permutation index, x, y, temperature].
    perms = jnp.stack(
        [jax.random.permutation(jax.random.fold_in(k_perm, i), problem_dim)
         for i in range(n_problems)]
    ).astype(jnp.float32)[..., None]                                   # (N, P, 1)
    coords = jax.random.uniform(k_coord, (n_problems, problem_dim, 2), jnp.float32)
    temp = jnp.broadcast_to(
        jax.random.uniform(k_temp, (n_problems, 1, 1), jnp.float32),
        (n_problems, problem_dim, 1))
    state = jnp.concatenate([perms, coords, temp], axis=-1)            # (N, P, 4)

    w1, b1, w2, b2 = init_params(k_w, embed_dim)

    out = tsp_critic_forward(state, w1, b1, w2, b2)
    out = jax.block_until_ready(out)

    ref = _reference_forward(state, w1, b1, w2, b2)
    assert out.shape == (n_problems,)
    assert jnp.allclose(out, ref, atol=1e-5, rtol=1e-5), (out, ref)

    print("KERNEL_OK")
</pallas_src>

<mosaic_0001>
module attributes {stable_mosaic.version = 11 : i64} {
  func.func @_critic_kernel(%arg0: i32, %arg1: memref<8x1024xf32, #tpu.memory_space<vmem>>, %arg2: memref<32x8xf32, #tpu.memory_space<vmem>>, %arg3: memref<32x1xf32, #tpu.memory_space<vmem>>, %arg4: memref<1x32xf32, #tpu.memory_space<vmem>>, %arg5: memref<1024x128xf32, #tpu.memory_space<vmem>>, %arg6: memref<1x1xf32, #tpu.memory_space<smem>>, %arg7: memref<1x128xf32, #tpu.memory_space<vmem>>) attributes {dimension_semantics = [#tpu.dimension_semantics<parallel>], iteration_bounds = array<i64: 1>, scalar_prefetch = 0 : i64, scratch_operands = 0 : i64, tpu.core_type = #tpu.core_type<tc>, window_params = [{transform_indices = @transform_0, window_bounds = array<i64: 8, 1024>}, {pipeline_mode = #tpu.pipeline_mode<synchronous>, transform_indices = @transform_1, window_bounds = array<i64: 32, 8>}, {pipeline_mode = #tpu.pipeline_mode<synchronous>, transform_indices = @transform_2, window_bounds = array<i64: 32, 1>}, {pipeline_mode = #tpu.pipeline_mode<synchronous>, transform_indices = @transform_3, window_bounds = array<i64: 1, 32>}, {pipeline_mode = #tpu.pipeline_mode<synchronous>, transform_indices = @transform_4, window_bounds = array<i64: 1024, 128>}, {transform_indices = @transform_5, window_bounds = array<i64: 1, 1>}, {transform_indices = @transform_6, window_bounds = array<i64: 1, 128>}]} {
    %c0 = arith.constant 0 : index
    %c0_0 = arith.constant 0 : index
    %0 = vector.load %arg2[%c0, %c0_0] : memref<32x8xf32, #tpu.memory_space<vmem>>, vector<32x8xf32>
    %c0_1 = arith.constant 0 : index
    %c0_2 = arith.constant 0 : index
    %1 = vector.load %arg1[%c0_1, %c0_2] : memref<8x1024xf32, #tpu.memory_space<vmem>>, vector<8x1024xf32>
    %cst = arith.constant dense<0.000000e+00> : vector<32x1024xf32>
    %2 = tpu.matmul %0, %1, %cst {dimension_numbers = #tpu.dot_dimension_numbers<[1], [0], [0], [1], [0, 0, 1, 1], [], []>} : vector<32x8xf32>, vector<8x1024xf32>, vector<32x1024xf32> -> vector<32x1024xf32>
    %c0_3 = arith.constant 0 : index
    %c0_4 = arith.constant 0 : index
    %3 = vector.load %arg3[%c0_3, %c0_4] : memref<32x1xf32, #tpu.memory_space<vmem>>, vector<32x1xf32>
    %4 = vector.broadcast %3 : vector<32x1xf32> to vector<32x1024xf32>
    %5 = arith.addf %2, %4 : vector<32x1024xf32>
    %cst_5 = arith.constant 0.000000e+00 : f32
    %6 = vector.broadcast %cst_5 : f32 to vector<32x1024xf32>
    %7 = arith.maximumf %5, %6 : vector<32x1024xf32>
    %c0_6 = arith.constant 0 : index
    %c0_7 = arith.constant 0 : index
    %8 = vector.load %arg5[%c0_6, %c0_7] : memref<1024x128xf32, #tpu.memory_space<vmem>>, vector<1024x128xf32>
    %cst_8 = arith.constant dense<0.000000e+00> : vector<32x128xf32>
    %9 = tpu.matmul %7, %8, %cst_8 {dimension_numbers = #tpu.dot_dimension_numbers<[1], [0], [0], [1], [0, 0, 1, 1], [], []>} : vector<32x1024xf32>, vector<1024x128xf32>, vector<32x128xf32> -> vector<32x128xf32>
    %c0_9 = arith.constant 0 : index
    %c0_10 = arith.constant 0 : index
    %10 = vector.load %arg4[%c0_9, %c0_10] : memref<1x32xf32, #tpu.memory_space<vmem>>, vector<1x32xf32>
    %cst_11 = arith.constant dense<0.000000e+00> : vector<1x128xf32>
    %11 = tpu.matmul %10, %9, %cst_11 {dimension_numbers = #tpu.dot_dimension_numbers<[1], [0], [0], [1], [0, 0, 1, 1], [], []>} : vector<1x32xf32>, vector<32x128xf32>, vector<1x128xf32> -> vector<1x128xf32>
    %c0_12 = arith.constant 0 : index
    %c0_13 = arith.constant 0 : index
    %12 = memref.load %arg6[%c0_12, %c0_13] : memref<1x1xf32, #tpu.memory_space<smem>>
    %13 = vector.broadcast %12 : f32 to vector<1x128xf32>
    %14 = arith.addf %11, %13 : vector<1x128xf32>
    %c0_14 = arith.constant 0 : index
    %c0_15 = arith.constant 0 : index
    %15 = vector.load %arg7[%c0_14, %c0_15] : memref<1x128xf32, #tpu.memory_space<vmem>>, vector<1x128xf32>
    tpu.vector_store %arg7[%c0_14, %c0_15], %14 {strides = array<i32>} : memref<1x128xf32, #tpu.memory_space<vmem>>, vector<1x128xf32>,
    return
  }
  func.func @transform_0(%arg0: i32) -> (i32, i32) {
    %c0_i32 = arith.constant 0 : i32
    %c0_i32_0 = arith.constant 0 : i32
    return %c0_i32, %arg0 : i32, i32
  }
  func.func @transform_1(%arg0: i32) -> (i32, i32) {
    %c0_i32 = arith.constant 0 : i32
    %c0_i32_0 = arith.constant 0 : i32
    %c0_i32_1 = arith.constant 0 : i32
    return %c0_i32, %c0_i32_0 : i32, i32
  }
  func.func @transform_2(%arg0: i32) -> (i32, i32) {
    %c0_i32 = arith.constant 0 : i32
    %c0_i32_0 = arith.constant 0 : i32
    %c0_i32_1 = arith.constant 0 : i32
    return %c0_i32, %c0_i32_0 : i32, i32
  }
  func.func @transform_3(%arg0: i32) -> (i32, i32) {
    %c0_i32 = arith.constant 0 : i32
    %c0_i32_0 = arith.constant 0 : i32
    %c0_i32_1 = arith.constant 0 : i32
    return %c0_i32, %c0_i32_0 : i32, i32
  }
  func.func @transform_4(%arg0: i32) -> (i32, i32) {
    %c0_i32 = arith.constant 0 : i32
    %c0_i32_0 = arith.constant 0 : i32
    %c0_i32_1 = arith.constant 0 : i32
    return %c0_i32, %c0_i32_0 : i32, i32
  }
  func.func @transform_5(%arg0: i32) -> (i32, i32) {
    %c0_i32 = arith.constant 0 : i32
    %c0_i32_0 = arith.constant 0 : i32
    %c0_i32_1 = arith.constant 0 : i32
    return %c0_i32, %c0_i32_0 : i32, i32
  }
  func.func @transform_6(%arg0: i32) -> (i32, i32) {
    %c0_i32 = arith.constant 0 : i32
    %c0_i32_0 = arith.constant 0 : i32
    return %arg0, %c0_i32 : i32, i32
  }
}

</mosaic_0001>

<bundles_post_ra>
// kernel: tpu_custom_call.1
= control target key start
LH: loop header
LB: loop body
LE: loop exit
PB: predicated region body
PF: predicated region fallthrough
CT: control target
= control target key end

     0   :  { %12 = vsyncpa [#allocation4], 0  ;;  %s1496_s0 = inlined_call_operand.vmem [shape: f32[8,1024], index: 0, kind: input, shape index: {}]   ;;  %s1497_s1 = inlined_call_operand.vmem [shape: f32[32,8], index: 1, kind: input, shape index: {}]   ;;  %s1498_s2 = inlined_call_operand.vmem [shape: f32[32,1], index: 2, kind: input, shape index: {}]   ;;  %s1499_s3 = inlined_call_operand.vmem [shape: f32[1,32], index: 3, kind: input, shape index: {}]   ;;  %s1500_s4 = inlined_call_operand.hbm [shape: f32[1024,128], index: 4, kind: input, shape index: {}]   ;;  %s1501_s5 = inlined_call_operand.<no memory space> [shape: f32[1,1], index: 5, kind: input, shape index: {}]   ;;  %s1502_s6 = inlined_call_operand.hbm [shape: f32[1,128], index: 6, kind: output, shape index: {}]  }
   0x1   :  { %13 = vsyncpa [#allocation5], 0  ;;  %s1299_s21 = smov [#allocation3]  }
   0x2   :  { %s27_s22 = sshll.u32 %s1299_s21, 4  ;;  %s28_s22 = int_to_ptr.vmem [resolvable:$true] %s27_s22 }
   0x3   :  { %s1263_s23 = scalar_lea.vmem %s28_s22, 16384  ;;  %p1268_p1 = scmp.lt.s32.totalorder %s28_s22, %s28_s22 }
   0x4   :  { %p1264_p0 = scmp.ne.s32.totalorder %s28_s22, %s1263_s23  ;;  %p1269_p2 = scmp.lt.s32.totalorder %s1263_s23, %s1263_s23 }
   0x6   :  { %p1270_p3 = por %p1269_p2, %p1268_p1 }
   0x8   :  { %p1271_p4 = pnand %p1270_p3, %p1264_p0 }
   0xa   :  { %1274 = shalt.err (!%p1271_p4)
}
   0xb   :  { %s1300_s24 = smov 128   ;;  %s1301_s25 = smov 8  }
   0xc   :  { %33 = dma.hbm_to_vmem [thread:$0]  %s1500_s4, 16384, %s28_s22, [#allocation4], %s1300_s24, %s1300_s24, %s1301_s25  }
   0xd   :  { %1295 = dma.done.wait [#allocation4], 16384  }
   0xe   :  { %1296 = vsyncadd [#allocation4], 4294950912  ;;  %v1302_v0 = vmov 0.0   ;;  %v1303_v1 = vmov 0   ;;  %v44_v2 = vld [vmem:[%s1496_s0 + $0x8] sm:$0xff]  ;;  %v46_v3 = vld [vmem:[%s1496_s0 + $0x18] sm:$0xff] }
   0xf   :  { %152 = vmatprep.mubr.f32.mxu0 %v1302_v0  ;;  %241 = vmatprep.mubr.f32.mxu1 %v1302_v0  ;;  %v43_v4 = vld [vmem:[%s1496_s0] sm:$0xff]  ;;  %vm75_vm0 = vcmask 64512   ;;  %v45_v5 = vld [vmem:[%s1496_s0 + $0x10] sm:$0xff]  ;;  %v48_v7 = vld [vmem:[%s1496_s0 + $0x28] sm:$0xff]  ;;  %vm1304_vm1 = vmmov 0   ;;  %vm947_vm2 = vcmask 261120  }
  0x10   :  { %1253 = vset.pattern.permute.xlu0 %v1303_v1  ;;  %1254 = vset.pattern.permute.xlu1 %v1303_v1  ;;  %v39_v6 = vld [vmem:[%s1497_s1] sm:$0xff]  ;;  %v50_v8 = vld [vmem:[%s1496_s0 + $0x38] sm:$0xff]  ;;  %v49_v10 = vld [vmem:[%s1496_s0 + $0x30] sm:$0xff]  ;;  %s1305_s11 = smov [#allocation6]  }
  0x11   :  { %118 = vmatprep.subr.mxu0 %v44_v2  ;;  %207 = vmatprep.subr.mxu1 %v46_v3  ;;  %v47_v9 = vld [vmem:[%s1496_s0 + $0x20] sm:$0xff]  ;;  %v40_v11 = vld [vmem:[%s1497_s1 + $0x8] sm:$0xff]  ;;  %v53_v13 = vld [vmem:[%s1498_s2 + $0x10] sm:$0xff]  ;;  %s1028_s12 = sshll.u32 %s1305_s11, 4  ;;  %s1029_s12 = int_to_ptr.vmem [resolvable:$true] %s1028_s12 }
  0x12   :  { %119 = vmatpush1.msra.mxu0 %v43_v4  ;;  %208 = vmatpush1.msra.mxu1 %v45_v5  ;;  %v51_v12 = vld [vmem:[%s1498_s2] sm:$0xff]  ;;  %v507_v14 = vld [vmem:[#allocation3 + $0xf8] sm:$0xff]  ;;  %v41_v16 = vld [vmem:[%s1497_s1 + $0x10] sm:$0xff]  ;;  %s1275_s13 = scalar_lea.vmem %s1029_s12, 16  ;;  %s1279_s14 = scalar_lea.vmem %s1029_s12, 32 }
  0x13   :  { %1037 = vmatmul.mubr.msk.f32.vlgmr.msra.gmra.mxu0 %vm75_vm0, %v39_v6  ;;  %1041 = vmatmul.mubr.msk.f32.vlgmr.msra.gmra.mxu1 %vm75_vm0, %v39_v6  ;;  %v539_v15 = vld [vmem:[#allocation3 + $0x1f8] sm:$0xff]  ;;  %v52_v17 = vld [vmem:[%s1498_s2 + $0x8] sm:$0xff]  ;;  %v506_v22 = vld [vmem:[#allocation3 + $0xf0] sm:$0xff]  ;;  %p1276_p5 = scmp.ne.s32.totalorder %s1029_s12, %s1275_s13  ;;  %p1280_p6 = scmp.lt.s32.totalorder %s1029_s12, %s1029_s12 }
  0x14   :  { %158 = vmatprep.mubr.f32.mxu0 %v1302_v0  ;;  %247 = vmatprep.mubr.f32.mxu1 %v1302_v0  ;;  %v54_v18 = vld [vmem:[%s1498_s2 + $0x18] sm:$0xff]  ;;  %v538_v23 = vld [vmem:[#allocation3 + $0x1f0] sm:$0xff]  ;;  %v505_v26 = vld [vmem:[#allocation3 + $0xe8] sm:$0xff]  ;;  %p1281_p7 = scmp.lt.s32.totalorder %s1279_s14, %s1275_s13 }
  0x15   :  { %296 = vmatprep.subr.mxu0 %v48_v7  ;;  %385 = vmatprep.subr.mxu1 %v50_v8  ;;  %v42_v19 = vld [vmem:[%s1497_s1 + $0x18] sm:$0xff]  ;;  %v490_v24 = vld [vmem:[#allocation3 + $0x70] sm:$0xff]  ;;  %v537_v27 = vld [vmem:[#allocation3 + $0x1e8] sm:$0xff] }
  0x16   :  { %297 = vmatpush1.msra.mxu0 %v47_v9  ;;  %386 = vmatpush1.msra.mxu1 %v49_v10  ;;  %v491_v20 = vld [vmem:[#allocation3 + $0x78] sm:$0xff]  ;;  %v522_v25 = vld [vmem:[#allocation3 + $0x170] sm:$0xff]  ;;  %v489_v28 = vld [vmem:[#allocation3 + $0x68] sm:$0xff]  ;;  %p1282_p8 = por %p1281_p7, %p1280_p6 }
  0x17   :  { %1038 = vmatmul.mubr.msk.f32.gmra.mxu0 %vm75_vm0, %v40_v11  ;;  %1042 = vmatmul.mubr.msk.f32.gmra.mxu1 %vm75_vm0, %v40_v11  ;;  %v523_v21 = vld [vmem:[#allocation3 + $0x178] sm:$0xff]  ;;  %v521_v29 = vld [vmem:[#allocation3 + $0x168] sm:$0xff]  ;;  %v504_v30 = vld [vmem:[#allocation3 + $0xe0] sm:$0xff] }
  0x18   :  { %164 = vmatprep.mubr.f32.mxu0 %v1302_v0  ;;  %253 = vmatprep.mubr.f32.mxu1 %v1302_v0  ;;  %v536_v31 = vld [vmem:[#allocation3 + $0x1e0] sm:$0xff]  ;;  %v503_v34 = vld [vmem:[#allocation3 + $0xd8] sm:$0xff]  ;;  %v502_v38 = vld [vmem:[#allocation3 + $0xd0] sm:$0xff]  ;;  %p1283_p9 = pnand %p1282_p8, %p1276_p5 }
  0x19   :  { %57 = vperm.xlu0 %1253, %v51_v12   ;;  %67 = vperm.xlu1 %1254, %v53_v13   ;;  %v488_v32 = vld [vmem:[#allocation3 + $0x60] sm:$0xff]  ;;  %v535_v35 = vld [vmem:[#allocation3 + $0x1d8] sm:$0xff]  ;;  %v534_v39 = vld [vmem:[#allocation3 + $0x1d0] sm:$0xff] }
  0x1a   :  { %1054 = vmatprep.subr.mxu0 %v507_v14  ;;  %1098 = vmatprep.subr.mxu1 %v539_v15  ;;  %v520_v33 = vld [vmem:[#allocation3 + $0x160] sm:$0xff]  ;;  %v487_v36 = vld [vmem:[#allocation3 + $0x58] sm:$0xff]  ;;  %v486_v40 = vld [vmem:[#allocation3 + $0x50] sm:$0xff] }
  0x1b   :  { %1039 = vmatmul.mubr.msk.f32.gmra.mxu0 %vm75_vm0, %v41_v16  ;;  %1043 = vmatmul.mubr.msk.f32.gmra.mxu1 %vm75_vm0, %v41_v16  ;;  %v519_v37 = vld [vmem:[#allocation3 + $0x158] sm:$0xff]  ;;  %v518_v41 = vld [vmem:[#allocation3 + $0x150] sm:$0xff]  ;;  %v501_v42 = vld [vmem:[#allocation3 + $0xc8] sm:$0xff] }
  0x1c   :  { %170 = vmatprep.mubr.f32.mxu0 %v1302_v0  ;;  %259 = vmatprep.mubr.f32.mxu1 %v1302_v0  ;;  %v533_v43 = vld [vmem:[#allocation3 + $0x1c8] sm:$0xff]  ;;  %v500_v46 = vld [vmem:[#allocation3 + $0xc0] sm:$0xff]  ;;  %v499_v50 = vld [vmem:[#allocation3 + $0xb8] sm:$0xff] }
  0x1d   :  { %62 = vperm.xlu0 %1253, %v52_v17   ;;  %72 = vperm.xlu1 %1254, %v54_v18   ;;  %v485_v44 = vld [vmem:[#allocation3 + $0x48] sm:$0xff]  ;;  %v532_v47 = vld [vmem:[#allocation3 + $0x1c0] sm:$0xff]  ;;  %v531_v51 = vld [vmem:[#allocation3 + $0x1b8] sm:$0xff] }
  0x1e   :  { %v517_v45 = vld [vmem:[#allocation3 + $0x148] sm:$0xff]  ;;  %v484_v48 = vld [vmem:[#allocation3 + $0x40] sm:$0xff]  ;;  %v483_v52 = vld [vmem:[#allocation3 + $0x38] sm:$0xff] }
  0x1f   :  { %1040 = vmatmul.mubr.msk.f32.gmra.mxu0 %vm75_vm0, %v42_v19  ;;  %1044 = vmatmul.mubr.msk.f32.gmra.mxu1 %vm75_vm0, %v42_v19  ;;  %v516_v49 = vld [vmem:[#allocation3 + $0x140] sm:$0xff]  ;;  %v515_v53 = vld [vmem:[#allocation3 + $0x138] sm:$0xff]  ;;  %v498_v54 = vld [vmem:[#allocation3 + $0xb0] sm:$0xff] }
  0x20   :  { %330 = vmatprep.mubr.f32.mxu0 %v1302_v0  ;;  %419 = vmatprep.mubr.f32.mxu1 %v1302_v0  ;;  %v530_v55 = vld [vmem:[#allocation3 + $0x1b0] sm:$0xff]  ;;  %v497_v58 = vld [vmem:[#allocation3 + $0xa8] sm:$0xff]  ;;  %v496_v62 = vld [vmem:[#allocation3 + $0xa0] sm:$0xff] }
  0x21   :  { %v482_v56 = vld [vmem:[#allocation3 + $0x30] sm:$0xff]  ;;  %v529_v59 = vld [vmem:[#allocation3 + $0x1a8] sm:$0xff]  ;;  %v528_v63 = vld [vmem:[#allocation3 + $0x1a0] sm:$0xff] }
  0x22   :  { %v514_v57 = vld [vmem:[#allocation3 + $0x130] sm:$0xff]  ;;  %v481_v60 = vld [vmem:[#allocation3 + $0x28] sm:$0xff]  ;;  %v480_v1 = vld [vmem:[#allocation3 + $0x20] sm:$0xff] }
  0x23   :  { %1045 = vmatmul.mubr.msk.f32.vlgmr.msra.gmra.mxu0 %vm75_vm0, %v39_v6  ;;  %1049 = vmatmul.mubr.msk.f32.vlgmr.msra.gmra.mxu1 %vm75_vm0, %v39_v6  ;;  %v513_v61 = vld [vmem:[#allocation3 + $0x128] sm:$0xff]  ;;  %v512_v2 = vld [vmem:[#allocation3 + $0x120] sm:$0xff]  ;;  %v495_v3 = vld [vmem:[#allocation3 + $0x98] sm:$0xff] }
  0x24   :  { %336 = vmatprep.mubr.f32.mxu0 %v1302_v0  ;;  %425 = vmatprep.mubr.f32.mxu1 %v1302_v0  ;;  %v527_v4 = vld [vmem:[#allocation3 + $0x198] sm:$0xff]  ;;  %v494_v7 = vld [vmem:[#allocation3 + $0x90] sm:$0xff]  ;;  %v525_v12 = vld [vmem:[#allocation3 + $0x188] sm:$0xff] }
  0x25   :  { %1055 = vmatpush3.msra.mxu0 %v491_v20  ;;  %1099 = vmatpush3.msra.mxu1 %v523_v21  ;;  %v479_v5 = vld [vmem:[#allocation3 + $0x18] sm:$0xff]  ;;  %v526_v8 = vld [vmem:[#allocation3 + $0x190] sm:$0xff]  ;;  %v477_v13 = vld [vmem:[#allocation3 + $0x8] sm:$0xff] }
  0x26   :  { %1056 = vmatprep.subr.mxu0 %v506_v22  ;;  %1100 = vmatprep.subr.mxu1 %v538_v23  ;;  %v511_v6 = vld [vmem:[#allocation3 + $0x118] sm:$0xff]  ;;  %v478_v9 = vld [vmem:[#allocation3 + $0x10] sm:$0xff]  ;;  %v509_v14 = vld [vmem:[#allocation3 + $0x108] sm:$0xff] }
  0x27   :  { %1046 = vmatmul.mubr.msk.f32.gmra.mxu0 %vm75_vm0, %v40_v11  ;;  %1050 = vmatmul.mubr.msk.f32.gmra.mxu1 %vm75_vm0, %v40_v11  ;;  %v510_v10 = vld [vmem:[#allocation3 + $0x110] sm:$0xff]  ;;  %v493_v11 = vld [vmem:[#allocation3 + $0x88] sm:$0xff]  ;;  %v492_v15 = vld [vmem:[#allocation3 + $0x80] sm:$0xff] }
  0x28   :  { %342 = vmatprep.mubr.f32.mxu0 %v1302_v0  ;;  %431 = vmatprep.mubr.f32.mxu1 %v1302_v0  ;;  %v476_v17 = vld [vmem:[#allocation3] sm:$0xff]  ;;  %v603_v20 = vld [vmem:[#allocation3 + $0x3f8] sm:$0xff] }
  0x29   :  { %1057 = vmatpush3.msra.mxu0 %v490_v24  ;;  %1101 = vmatpush3.msra.mxu1 %v522_v25  ;;  %v508_v18 = vld [vmem:[#allocation3 + $0x100] sm:$0xff] }
  0x2a   :  { %1058 = vmatprep.subr.mxu0 %v505_v26  ;;  %1102 = vmatprep.subr.mxu1 %v537_v27 }
  0x2b   :  { %1047 = vmatmul.mubr.msk.f32.gmra.mxu0 %vm75_vm0, %v41_v16  ;;  %1051 = vmatmul.mubr.msk.f32.gmra.mxu1 %vm75_vm0, %v41_v16  ;;  %v524_v16 = vld [vmem:[#allocation3 + $0x180] sm:$0xff] }
  0x2c   :  { %348 = vmatprep.mubr.f32.mxu0 %v1302_v0  ;;  %437 = vmatprep.mubr.f32.mxu1 %v1302_v0 }
  0x2d   :  { %1059 = vmatpush3.msra.mxu0 %v489_v28  ;;  %1103 = vmatpush3.msra.mxu1 %v521_v29 }
  0x2e   :  { %1060 = vmatprep.subr.mxu0 %v504_v30  ;;  %1104 = vmatprep.subr.mxu1 %v536_v31 }
  0x2f   :  { %1048 = vmatmul.mubr.msk.f32.gmra.mxu0 %vm75_vm0, %v42_v19  ;;  %1052 = vmatmul.mubr.msk.f32.gmra.mxu1 %vm75_vm0, %v42_v19  ;;  %v571_v19 = vld [vmem:[#allocation3 + $0x2f8] sm:$0xff] }
  0x30   :  { %1061 = vmatpush3.msra.mxu0 %v488_v32  ;;  %1105 = vmatpush3.msra.mxu1 %v520_v33 }
  0x31   :  { %1062 = vmatprep.subr.mxu0 %v503_v34  ;;  %1106 = vmatprep.subr.mxu1 %v535_v35 }
  0x32   :  { %1063 = vmatpush3.msra.mxu0 %v487_v36  ;;  %1107 = vmatpush3.msra.mxu1 %v519_v37 }
  0x33   :  { %1064 = vmatprep.subr.mxu0 %v502_v38  ;;  %1108 = vmatprep.subr.mxu1 %v534_v39  ;;  %v555_v39 = vld [vmem:[#allocation3 + $0x278] sm:$0xff] }
  0x34   :  { %1065 = vmatpush3.msra.mxu0 %v486_v40  ;;  %1109 = vmatpush3.msra.mxu1 %v518_v41  ;;  %v587_v40 = vld [vmem:[#allocation3 + $0x378] sm:$0xff] }
  0x35   :  { %1066 = vmatprep.subr.mxu0 %v501_v42  ;;  %1110 = vmatprep.subr.mxu1 %v533_v43  ;;  %v570_v43 = vld [vmem:[#allocation3 + $0x2f0] sm:$0xff] }
  0x36   :  { %1067 = vmatpush3.msra.mxu0 %v485_v44  ;;  %1111 = vmatpush3.msra.mxu1 %v517_v45  ;;  %v602_v44 = vld [vmem:[#allocation3 + $0x3f0] sm:$0xff] }
  0x37   :  { %1068 = vmatprep.subr.mxu0 %v500_v46  ;;  %1112 = vmatprep.subr.mxu1 %v532_v47 }
  0x38   :  { %1069 = vmatpush3.msra.mxu0 %v484_v48  ;;  %1113 = vmatpush3.msra.mxu1 %v516_v49  ;;  %v554_v49 = vld [vmem:[#allocation3 + $0x270] sm:$0xff] }
  0x39   :  { %1070 = vmatprep.subr.mxu0 %v499_v50  ;;  %1114 = vmatprep.subr.mxu1 %v531_v51  ;;  %v586_v50 = vld [vmem:[#allocation3 + $0x370] sm:$0xff] }
  0x3a   :  { %1071 = vmatpush3.msra.mxu0 %v483_v52  ;;  %1115 = vmatpush3.msra.mxu1 %v515_v53 }
  0x3b   :  { %1072 = vmatprep.subr.mxu0 %v498_v54  ;;  %1116 = vmatprep.subr.mxu1 %v530_v55 }
  0x3c   :  { %1073 = vmatpush3.msra.mxu0 %v482_v56  ;;  %1117 = vmatpush3.msra.mxu1 %v514_v57  ;;  %v569_v56 = vld [vmem:[#allocation3 + $0x2e8] sm:$0xff] }
  0x3d   :  { %1074 = vmatprep.subr.mxu0 %v497_v58  ;;  %1118 = vmatprep.subr.mxu1 %v529_v59  ;;  %v601_v57 = vld [vmem:[#allocation3 + $0x3e8] sm:$0xff] }
  0x3e   :  { %1075 = vmatpush3.msra.mxu0 %v481_v60  ;;  %1119 = vmatpush3.msra.mxu1 %v513_v61 }
  0x3f   :  { %1076 = vmatprep.subr.mxu0 %v496_v62  ;;  %1120 = vmatprep.subr.mxu1 %v528_v63  ;;  %v553_v62 = vld [vmem:[#allocation3 + $0x268] sm:$0xff] }
  0x40   :  { %1077 = vmatpush3.msra.mxu0 %v480_v1  ;;  %1121 = vmatpush3.msra.mxu1 %v512_v2  ;;  %v585_v63 = vld [vmem:[#allocation3 + $0x368] sm:$0xff] }
  0x41   :  { %1078 = vmatprep.subr.mxu0 %v495_v3  ;;  %1122 = vmatprep.subr.mxu1 %v527_v4  ;;  %v568_v3 = vld [vmem:[#allocation3 + $0x2e0] sm:$0xff] }
  0x42   :  { %1079 = vmatpush3.msra.mxu0 %v479_v5  ;;  %1123 = vmatpush3.msra.mxu1 %v511_v6  ;;  %v600_v4 = vld [vmem:[#allocation3 + $0x3e0] sm:$0xff] }
  0x43   :  { %1080 = vmatprep.subr.mxu0 %v494_v7  ;;  %1124 = vmatprep.subr.mxu1 %v526_v8  ;;  %v552_v7 = vld [vmem:[#allocation3 + $0x260] sm:$0xff] }
  0x44   :  { %1081 = vmatpush3.msra.mxu0 %v478_v9  ;;  %1125 = vmatpush3.msra.mxu1 %v510_v10  ;;  %v584_v8 = vld [vmem:[#allocation3 + $0x360] sm:$0xff] }
  0x45   :  { %1082 = vmatprep.subr.mxu0 %v493_v11  ;;  %1126 = vmatprep.subr.mxu1 %v525_v12  ;;  %v567_v11 = vld [vmem:[#allocation3 + $0x2d8] sm:$0xff] }
  0x46   :  { %1083 = vmatpush3.msra.mxu0 %v477_v13  ;;  %1127 = vmatpush3.msra.mxu1 %v509_v14  ;;  %v599_v12 = vld [vmem:[#allocation3 + $0x3d8] sm:$0xff] }
  0x47   :  { %1084 = vmatprep.subr.mxu0 %v492_v15  ;;  %1128 = vmatprep.subr.mxu1 %v524_v16  ;;  %v551_v16 = vld [vmem:[#allocation3 + $0x258] sm:$0xff] }
  0x48   :  { %1085 = vmatpush3.msra.mxu0 %v476_v17  ;;  %1129 = vmatpush3.msra.mxu1 %v508_v18  ;;  %v583_v17 = vld [vmem:[#allocation3 + $0x358] sm:$0xff] }
  0x49   :  { %1142 = vmatprep.subr.mxu0 %v571_v19  ;;  %1186 = vmatprep.subr.mxu1 %v603_v20  ;;  %v566_v20 = vld [vmem:[#allocation3 + $0x2d0] sm:$0xff] }
  0x94   :  { %v1424_v21 = vpop.permute.xlu0 %57  ;;  %v1436_v53 = vpop.permute.xlu1 %67 }
  0x98   :  { %v1430_v33 = vpop.permute.xlu0 %62  ;;  %v1442_v13 = vpop.permute.xlu1 %72 }
  0xd3   :  { %v154_v22 = vpop.f32.mrf.mxu0  ;;  %v243_v23 = vpop.f32.mrf.mxu1 }
  0xd4   :  { %v244_v24 = vadd.f32 %v243_v23, %v1424_v21  ;;  %v155_v25 = vadd.f32 %v154_v22, %v1424_v21  ;;  %v598_v22 = vld [vmem:[#allocation3 + $0x3d0] sm:$0xff] }
  0xd5   :  { %v156_v26 = vpop.f32.mrf.mxu0  ;;  %v245_v27 = vpop.f32.mrf.mxu1 }
  0xd6   :  { %v157_v28 = vadd.f32 %v156_v26, %v1424_v21  ;;  %v246_v29 = vadd.f32 %v245_v27, %v1424_v21  ;;  %v446_v30 = vmax.f32 %v244_v24, 0.0  ;;  %v444_v36 = vmax.f32 %v155_v25, 0.0 }
  0xd7   :  { %v160_v31 = vpop.f32.mrf.mxu0  ;;  %v249_v32 = vpop.f32.mrf.mxu1 }
  0xd8   :  { %v445_v34 = vmax.f32 %v157_v28, 0.0  ;;  %v447_v35 = vmax.f32 %v246_v29, 0.0  ;;  %v161_v45 = vadd.f32 %v160_v31, %v1430_v33  ;;  %v250_v46 = vadd.f32 %v249_v32, %v1430_v33  ;;  %v550_v29 = vld [vmem:[#allocation3 + $0x250] sm:$0xff] }
  0xd9   :  { %v162_v37 = vpop.f32.mrf.mxu0  ;;  %v251_v38 = vpop.f32.mrf.mxu1 }
  0xda   :  { %v163_v41 = vadd.f32 %v162_v37, %v1430_v33  ;;  %v252_v42 = vadd.f32 %v251_v38, %v1430_v33  ;;  %668 = vmatprep.mubr.f32.mxu0 %v445_v34  ;;  %753 = vmatprep.mubr.f32.mxu1 %v447_v35  ;;  %v452_v58 = vmax.f32 %v161_v45, 0.0  ;;  %v454_v59 = vmax.f32 %v250_v46, 0.0  ;;  %v565_v34 = vld [vmem:[#allocation3 + $0x2c8] sm:$0xff] }
  0xdb   :  { %v166_v47 = vpop.f32.mrf.mxu0  ;;  %v255_v48 = vpop.f32.mrf.mxu1  ;;  %669 = vmatmul.mubr.f32.vlgmr.msra.gmra.mxu0 %v444_v36  ;;  %754 = vmatmul.mubr.f32.vlgmr.msra.gmra.mxu1 %v446_v30  ;;  %v582_v30 = vld [vmem:[#allocation3 + $0x350] sm:$0xff]  ;;  %v597_v35 = vld [vmem:[#allocation3 + $0x3c8] sm:$0xff] }
  0xdc   :  { %v453_v51 = vmax.f32 %v163_v41, 0.0  ;;  %v455_v52 = vmax.f32 %v252_v42, 0.0  ;;  %1143 = vmatpush3.msra.mxu0 %v555_v39  ;;  %1187 = vmatpush3.msra.mxu1 %v587_v40  ;;  %v167_v9 = vadd.f32 %v166_v47, %v1436_v53  ;;  %v256_v10 = vadd.f32 %v255_v48, %v1436_v53  ;;  %v549_v37 = vld [vmem:[#allocation3 + $0x248] sm:$0xff]  ;;  %v564_v42 = vld [vmem:[#allocation3 + $0x2c0] sm:$0xff] }
  0xdd   :  { %1144 = vmatprep.subr.mxu0 %v570_v43  ;;  %1188 = vmatprep.subr.mxu1 %v602_v44  ;;  %v168_v54 = vpop.f32.mrf.mxu0  ;;  %v257_v55 = vpop.f32.mrf.mxu1  ;;  %v581_v38 = vld [vmem:[#allocation3 + $0x348] sm:$0xff]  ;;  %v596_v43 = vld [vmem:[#allocation3 + $0x3c0] sm:$0xff] }
  0xde   :  { %1145 = vmatpush3.msra.mxu0 %v554_v49  ;;  %1189 = vmatpush3.msra.mxu1 %v586_v50  ;;  %v169_v1 = vadd.f32 %v168_v54, %v1436_v53  ;;  %v258_v2 = vadd.f32 %v257_v55, %v1436_v53  ;;  %v460_v23 = vmax.f32 %v167_v9, 0.0  ;;  %v462_v24 = vmax.f32 %v256_v10, 0.0  ;;  %v548_v47 = vld [vmem:[#allocation3 + $0x240] sm:$0xff]  ;;  %v595_v54 = vld [vmem:[#allocation3 + $0x3b8] sm:$0xff] }
  0xdf   :  { %673 = vmatprep.mubr.f32.mxu0 %v453_v51  ;;  %758 = vmatprep.mubr.f32.mxu1 %v455_v52  ;;  %v172_v60 = vpop.f32.mrf.mxu0  ;;  %v261_v61 = vpop.f32.mrf.mxu1  ;;  %v580_v48 = vld [vmem:[#allocation3 + $0x340] sm:$0xff]  ;;  %v563_v52 = vld [vmem:[#allocation3 + $0x2b8] sm:$0xff] }
  0xe0   :  { %1146 = vmatprep.subr.mxu0 %v569_v56  ;;  %1190 = vmatprep.subr.mxu1 %v601_v57  ;;  %v461_v18 = vmax.f32 %v169_v1, 0.0  ;;  %v463_v19 = vmax.f32 %v258_v2, 0.0  ;;  %v173_v31 = vadd.f32 %v172_v60, %v1442_v13  ;;  %v262_v32 = vadd.f32 %v261_v61, %v1442_v13  ;;  %v547_v55 = vld [vmem:[#allocation3 + $0x238] sm:$0xff]  ;;  %v562_v57 = vld [vmem:[#allocation3 + $0x2b0] sm:$0xff]  ;;  %v593_v1 = vld [vmem:[#allocation3 + $0x3a8] sm:$0xff] }
  0xe1   :  { %674 = vmatmul.mubr.f32.gmra.mxu0 %v452_v58  ;;  %759 = vmatmul.mubr.f32.gmra.mxu1 %v454_v59  ;;  %v174_v5 = vpop.f32.mrf.mxu0  ;;  %v263_v6 = vpop.f32.mrf.mxu1  ;;  %v579_v56 = vld [vmem:[#allocation3 + $0x338] sm:$0xff]  ;;  %v594_v58 = vld [vmem:[#allocation3 + $0x3b0] sm:$0xff]  ;;  %v545_v2 = vld [vmem:[#allocation3 + $0x228] sm:$0xff] }
  0xe2   :  { %1147 = vmatpush3.msra.mxu0 %v553_v62  ;;  %1191 = vmatpush3.msra.mxu1 %v585_v63  ;;  %v175_v25 = vadd.f32 %v174_v5, %v1442_v13  ;;  %v264_v26 = vadd.f32 %v263_v6, %v1442_v13  ;;  %v468_v44 = vmax.f32 %v173_v31, 0.0  ;;  %v470_v45 = vmax.f32 %v262_v32, 0.0  ;;  %v546_v61 = vld [vmem:[#allocation3 + $0x230] sm:$0xff]  ;;  %v561_v63 = vld [vmem:[#allocation3 + $0x2a8] sm:$0xff]  ;;  %v592_v5 = vld [vmem:[#allocation3 + $0x3a0] sm:$0xff] }
  0xe3   :  { %1148 = vmatprep.subr.mxu0 %v568_v3  ;;  %1192 = vmatprep.subr.mxu1 %v600_v4  ;;  %v1444_v14 = vpop.f32.mrf.mxu0  ;;  %v1446_v15 = vpop.f32.mrf.mxu1  ;;  %v578_v62 = vld [vmem:[#allocation3 + $0x330] sm:$0xff]  ;;  %v577_v3 = vld [vmem:[#allocation3 + $0x328] sm:$0xff]  ;;  %v560_v4 = vld [vmem:[#allocation3 + $0x2a0] sm:$0xff] }
  0xe4   :  { %1149 = vmatpush3.msra.mxu0 %v552_v7  ;;  %1193 = vmatpush3.msra.mxu1 %v584_v8  ;;  %v469_v39 = vmax.f32 %v175_v25, 0.0  ;;  %v471_v40 = vmax.f32 %v264_v26, 0.0  ;;  %v544_v8 = vld [vmem:[#allocation3 + $0x220] sm:$0xff]  ;;  %v559_v10 = vld [vmem:[#allocation3 + $0x298] sm:$0xff]  ;;  %v589_v25 = vld [vmem:[#allocation3 + $0x388] sm:$0xff]  ;;  %v333_v26 = vadd.f32 %v1444_v14, %v1424_v21 }
  0xe5   :  { %1150 = vmatprep.subr.mxu0 %v567_v11  ;;  %1194 = vmatprep.subr.mxu1 %v599_v12  ;;  %v334_v27 = vpop.f32.mrf.mxu0  ;;  %v423_v28 = vpop.f32.mrf.mxu1  ;;  %v576_v9 = vld [vmem:[#allocation3 + $0x320] sm:$0xff]  ;;  %v591_v11 = vld [vmem:[#allocation3 + $0x398] sm:$0xff] }
  0xe6   :  { %1151 = vmatpush3.msra.mxu0 %v551_v16  ;;  %1195 = vmatpush3.msra.mxu1 %v583_v17  ;;  %v335_v36 = vadd.f32 %v334_v27, %v1424_v21  ;;  %v424_v41 = vadd.f32 %v423_v28, %v1424_v21  ;;  %v543_v12 = vld [vmem:[#allocation3 + $0x218] sm:$0xff]  ;;  %v558_v17 = vld [vmem:[#allocation3 + $0x290] sm:$0xff]  ;;  %v422_v27 = vadd.f32 %v1446_v15, %v1424_v21  ;;  %v541_v28 = vld [vmem:[#allocation3 + $0x208] sm:$0xff]  ;;  %v448_v21 = vmax.f32 %v333_v26, 0.0 }
  0xe7   :  { %678 = vmatprep.mubr.f32.mxu0 %v461_v18  ;;  %763 = vmatprep.mubr.f32.mxu1 %v463_v19  ;;  %v1454_v50 = vpop.f32.mrf.mxu0  ;;  %v1456_v51 = vpop.f32.mrf.mxu1  ;;  %v575_v16 = vld [vmem:[#allocation3 + $0x318] sm:$0xff]  ;;  %v590_v18 = vld [vmem:[#allocation3 + $0x390] sm:$0xff]  ;;  %v556_v32 = vld [vmem:[#allocation3 + $0x280] sm:$0xff] }
  0xe8   :  { %1152 = vmatprep.subr.mxu0 %v566_v20  ;;  %1196 = vmatprep.subr.mxu1 %v598_v22  ;;  %v449_v46 = vmax.f32 %v335_v36, 0.0  ;;  %v451_v49 = vmax.f32 %v424_v41, 0.0  ;;  %v542_v22 = vld [vmem:[#allocation3 + $0x210] sm:$0xff]  ;;  %v540_v14 = vld [vmem:[#allocation3 + $0x200] sm:$0xff]  ;;  %v450_v15 = vmax.f32 %v422_v27, 0.0 }
  0xe9   :  { %679 = vmatmul.mubr.f32.gmra.mxu0 %v460_v23  ;;  %764 = vmatmul.mubr.f32.gmra.mxu1 %v462_v24  ;;  %v340_v59 = vpop.f32.mrf.mxu0  ;;  %v429_v60 = vpop.f32.mrf.mxu1  ;;  %v574_v23 = vld [vmem:[#allocation3 + $0x310] sm:$0xff]  ;;  %v557_v24 = vld [vmem:[#allocation3 + $0x288] sm:$0xff] }
  0xea   :  { %1153 = vmatpush3.msra.mxu0 %v550_v29  ;;  %1197 = vmatpush3.msra.mxu1 %v582_v30  ;;  %v573_v29 = vld [vmem:[#allocation3 + $0x308] sm:$0xff]  ;;  %v341_v30 = vadd.f32 %v340_v59, %v1430_v33  ;;  %v430_v31 = vadd.f32 %v429_v60, %v1430_v33 }
  0xeb   :  { %1154 = vmatprep.subr.mxu0 %v565_v34  ;;  %1198 = vmatprep.subr.mxu1 %v597_v35  ;;  %v1458_v6 = vpop.f32.mrf.mxu0  ;;  %v1460_v7 = vpop.f32.mrf.mxu1  ;;  %v588_v34 = vld [vmem:[#allocation3 + $0x380] sm:$0xff] }
  0xec   :  { %1155 = vmatpush3.msra.mxu0 %v549_v37  ;;  %1199 = vmatpush3.msra.mxu1 %v581_v38  ;;  %v572_v37 = vld [vmem:[#allocation3 + $0x300] sm:$0xff]  ;;  %v339_v38 = vadd.f32 %v1454_v50, %v1430_v33  ;;  %v459_v41 = vmax.f32 %v430_v31, 0.0 }
  0xed   :  { %683 = vmatprep.mubr.f32.mxu0 %v469_v39  ;;  %768 = vmatprep.mubr.f32.mxu1 %v471_v40  ;;  %v346_v19 = vpop.f32.mrf.mxu0  ;;  %v435_v20 = vpop.f32.mrf.mxu1  ;;  %v428_v39 = vadd.f32 %v1456_v51, %v1430_v33  ;;  %v457_v40 = vmax.f32 %v341_v30, 0.0  ;;  %v345_v33 = vadd.f32 %v1458_v6, %v1436_v53 }
  0xee   :  { %1156 = vmatprep.subr.mxu0 %v564_v42  ;;  %1200 = vmatprep.subr.mxu1 %v596_v43  ;;  %v347_v42 = vadd.f32 %v346_v19, %v1436_v53  ;;  %v436_v43 = vadd.f32 %v435_v20, %v1436_v53 }
  0xef   :  { %684 = vmatmul.mubr.f32.gmra.mxu0 %v468_v44  ;;  %769 = vmatmul.mubr.f32.gmra.mxu1 %v470_v45  ;;  %v350_v35 = vpop.f32.mrf.mxu0  ;;  %v439_v36 = vpop.f32.mrf.mxu1 }
  0xf0   :  { %1157 = vmatpush3.msra.mxu0 %v548_v47  ;;  %1201 = vmatpush3.msra.mxu1 %v580_v48  ;;  %v458_v47 = vmax.f32 %v428_v39, 0.0  ;;  %v434_v48 = vadd.f32 %v1460_v7, %v1436_v53  ;;  %v467_v50 = vmax.f32 %v436_v43, 0.0 }
  0xf1   :  { %1158 = vmatprep.subr.mxu0 %v563_v52  ;;  %838 = vmatprep.mubr.f32.mxu0 %v449_v46  ;;  %v352_v44 = vpop.f32.mrf.mxu0  ;;  %v441_v45 = vpop.f32.mrf.mxu1  ;;  %v456_v46 = vmax.f32 %v339_v38, 0.0 }
  0xf2   :  { %1202 = vmatprep.subr.mxu1 %v595_v54  ;;  %923 = vmatprep.mubr.f32.mxu1 %v451_v49  ;;  %v465_v49 = vmax.f32 %v347_v42, 0.0  ;;  %v353_v51 = vadd.f32 %v352_v44, %v1442_v13  ;;  %v442_v52 = vadd.f32 %v441_v45, %v1442_v13  ;;  %v464_v54 = vmax.f32 %v345_v33, 0.0 }
  0xf3   :  { %1159 = vmatpush3.msra.mxu0 %v547_v55  ;;  %1203 = vmatpush3.msra.mxu1 %v579_v56  ;;  %v466_v55 = vmax.f32 %v434_v48, 0.0  ;;  %v351_v56 = vadd.f32 %v350_v35, %v1442_v13 }
  0xf4   :  { %1160 = vmatprep.subr.mxu0 %v562_v57  ;;  %1204 = vmatprep.subr.mxu1 %v594_v58  ;;  %v440_v57 = vadd.f32 %v439_v36, %v1442_v13  ;;  %v473_v58 = vmax.f32 %v353_v51, 0.0  ;;  %v475_v53 = vmax.f32 %v442_v52, 0.0 }
  0xf5   :  { %1161 = vmatpush3.msra.mxu0 %v546_v61  ;;  %1205 = vmatpush3.msra.mxu1 %v578_v62  ;;  %v472_v59 = vmax.f32 %v351_v56, 0.0 }
  0xf6   :  { %1162 = vmatprep.subr.mxu0 %v561_v63  ;;  %1206 = vmatprep.subr.mxu1 %v593_v1  ;;  %v474_v60 = vmax.f32 %v440_v57, 0.0 }
  0xf7   :  { %1163 = vmatpush3.msra.mxu0 %v545_v2  ;;  %1207 = vmatpush3.msra.mxu1 %v577_v3 }
  0xf8   :  { %1164 = vmatprep.subr.mxu0 %v560_v4  ;;  %1208 = vmatprep.subr.mxu1 %v592_v5 }
  0xf9   :  { %1165 = vmatpush3.msra.mxu0 %v544_v8  ;;  %1209 = vmatpush3.msra.mxu1 %v576_v9 }
  0xfa   :  { %1166 = vmatprep.subr.mxu0 %v559_v10  ;;  %1210 = vmatprep.subr.mxu1 %v591_v11 }
  0xfb   :  { %1167 = vmatpush3.msra.mxu0 %v543_v12  ;;  %1211 = vmatpush3.msra.mxu1 %v575_v16 }
  0xfc   :  { %1168 = vmatprep.subr.mxu0 %v558_v17  ;;  %1212 = vmatprep.subr.mxu1 %v590_v18 }
  0xfd   :  { %1169 = vmatpush3.msra.mxu0 %v542_v22  ;;  %1213 = vmatpush3.msra.mxu1 %v574_v23 }
  0xfe   :  { %1170 = vmatprep.subr.mxu0 %v557_v24  ;;  %1214 = vmatprep.subr.mxu1 %v589_v25 }
  0xff   :  { %1171 = vmatpush3.msra.mxu0 %v541_v28  ;;  %1215 = vmatpush3.msra.mxu1 %v573_v29 }
 0x100   :  { %1172 = vmatprep.subr.mxu0 %v556_v32  ;;  %1216 = vmatprep.subr.mxu1 %v588_v34 }
 0x101   :  { %1173 = vmatpush3.msra.mxu0 %v540_v14  ;;  %1217 = vmatpush3.msra.mxu1 %v572_v37 }
 0x102   :  { %839 = vmatmul.mubr.f32.vlgmr.msra.gmra.mxu0 %v448_v21  ;;  %924 = vmatmul.mubr.f32.vlgmr.msra.gmra.mxu1 %v450_v15 }
 0x103   :  { %843 = vmatprep.mubr.f32.mxu0 %v457_v40  ;;  %928 = vmatprep.mubr.f32.mxu1 %v459_v41 }
 0x104   :  { %1235 = vmatprep.subr.mxu0 %v1302_v0 }
 0x106   :  { %844 = vmatmul.mubr.f32.gmra.mxu0 %v456_v46  ;;  %929 = vmatmul.mubr.f32.gmra.mxu1 %v458_v47 }
 0x107   :  { %848 = vmatprep.mubr.f32.mxu0 %v465_v49  ;;  %933 = vmatprep.mubr.f32.mxu1 %v467_v50 }
 0x10a   :  { %849 = vmatmul.mubr.f32.gmra.mxu0 %v464_v54  ;;  %934 = vmatmul.mubr.f32.gmra.mxu1 %v466_v55 }
 0x10b   :  { %853 = vmatprep.mubr.f32.mxu0 %v473_v58  ;;  %938 = vmatprep.mubr.f32.mxu1 %v475_v53  ;;  %v944_v53 = vld [vmem:[%s1499_s3] sm:$0x1] }
 0x10e   :  { %854 = vmatmul.mubr.f32.gmra.mxu0 %v472_v59  ;;  %939 = vmatmul.mubr.f32.gmra.mxu1 %v474_v60  ;;  %v946_v59 = vstv %s1501_s5 }
 0x10f   :  { %1243 = vmatprep.mubr.msk.f32.mxu0 %vm1304_vm1, %v1302_v0 }
 0x19b   :  { %v1086_v61 = vpop.f32.mrf.mxu0  ;;  %v1130_v62 = vpop.f32.mrf.mxu1 }
 0x19d   :  { %v1087_v63 = vpop.f32.mrf.mxu0  ;;  %v1131_v1 = vpop.f32.mrf.mxu1 }
 0x19e   :  { %v1088_v21 = vadd.f32 %v1087_v63, %v1086_v61  ;;  %v1132_v15 = vadd.f32 %v1131_v1, %v1130_v62 }
 0x1a0   :  { %v756_v48 = vadd.f32 %v1132_v15, %v1088_v21 }
 0x1a1   :  { %v1089_v2 = vpop.f32.mrf.mxu0  ;;  %v1133_v3 = vpop.f32.mrf.mxu1 }
 0x1a3   :  { %v1090_v13 = vpop.f32.mrf.mxu0  ;;  %v1134_v4 = vpop.f32.mrf.mxu1 }
 0x1a4   :  { %v1091_v34 = vadd.f32 %v1090_v13, %v1089_v2  ;;  %v1135_v35 = vadd.f32 %v1134_v4, %v1133_v3 }
 0x1a6   :  { %v761_v44 = vadd.f32 %v1135_v35, %v1091_v34 }
 0x1a9   :  { %v1092_v5 = vpop.f32.mrf.mxu0  ;;  %v1136_v6 = vpop.f32.mrf.mxu1 }
 0x1ab   :  { %v1093_v7 = vpop.f32.mrf.mxu0  ;;  %v1137_v8 = vpop.f32.mrf.mxu1 }
 0x1ac   :  { %v1094_v29 = vadd.f32 %v1093_v7, %v1092_v5  ;;  %v1138_v30 = vadd.f32 %v1137_v8, %v1136_v6 }
 0x1ae   :  { %v766_v40 = vadd.f32 %v1138_v30, %v1094_v29 }
 0x1af   :  { %v1095_v9 = vpop.f32.mrf.mxu0  ;;  %v1139_v10 = vpop.f32.mrf.mxu1 }
 0x1b1   :  { %v1096_v11 = vpop.f32.mrf.mxu0  ;;  %v1140_v12 = vpop.f32.mrf.mxu1 }
 0x1b2   :  { %v1097_v31 = vadd.f32 %v1096_v11, %v1095_v9  ;;  %v1141_v32 = vadd.f32 %v1140_v12, %v1139_v10 }
 0x1b4   :  { %v771_v41 = vadd.f32 %v1141_v32, %v1097_v31 }
 0x1c2   :  { %v1174_v16 = vpop.f32.mrf.mxu0  ;;  %v1218_v17 = vpop.f32.mrf.mxu1 }
 0x1c4   :  { %v1175_v18 = vpop.f32.mrf.mxu0  ;;  %v1219_v19 = vpop.f32.mrf.mxu1 }
 0x1c5   :  { %v1176_v45 = vadd.f32 %v1175_v18, %v1174_v16  ;;  %v1220_v56 = vadd.f32 %v1219_v19, %v1218_v17 }
 0x1c6   :  { %v1177_v20 = vpop.f32.mrf.mxu0  ;;  %v1221_v22 = vpop.f32.mrf.mxu1 }
 0x1c7   :  { %v841_v52 = vadd.f32 %v1176_v45, %v756_v48 }
 0x1c8   :  { %v1178_v23 = vpop.f32.mrf.mxu0  ;;  %v1222_v24 = vpop.f32.mrf.mxu1 }
 0x1c9   :  { %v1179_v42 = vadd.f32 %v1178_v23, %v1177_v20  ;;  %v1223_v54 = vadd.f32 %v1222_v24, %v1221_v22  ;;  %v926_v58 = vadd.f32 %v1220_v56, %v841_v52 }
 0x1ca   :  { %v1180_v25 = vpop.f32.mrf.mxu0  ;;  %v1224_v26 = vpop.f32.mrf.mxu1 }
 0x1cb   :  { %v846_v49 = vadd.f32 %v1179_v42, %v761_v44 }
 0x1cc   :  { %v1181_v27 = vpop.f32.mrf.mxu0  ;;  %v1225_v28 = vpop.f32.mrf.mxu1 }
 0x1cd   :  { %v1182_v37 = vadd.f32 %v1181_v27, %v1180_v25  ;;  %v1226_v50 = vadd.f32 %v1225_v28, %v1224_v26  ;;  %v931_v57 = vadd.f32 %v1223_v54, %v846_v49 }
 0x1ce   :  { %v1183_v36 = vpop.f32.mrf.mxu0  ;;  %v1227_v14 = vpop.f32.mrf.mxu1 }
 0x1cf   :  { %v851_v46 = vadd.f32 %v1182_v37, %v766_v40 }
 0x1d0   :  { %v1184_v38 = vpop.f32.mrf.mxu0  ;;  %v1228_v39 = vpop.f32.mrf.mxu1 }
 0x1d1   :  { %v1185_v43 = vadd.f32 %v1184_v38, %v1183_v36  ;;  %v1229_v33 = vadd.f32 %v1228_v39, %v1227_v14  ;;  %v936_v55 = vadd.f32 %v1226_v50, %v851_v46 }
 0x1d3   :  { %v856_v47 = vadd.f32 %v1185_v43, %v771_v41 }
 0x1d5   :  { %v941_v51 = vadd.f32 %v1229_v33, %v856_v47 }
 0x1d7   :  { %1236 = vmatpush3.msra.mxu0 %v941_v51 }
 0x1d8   :  { %1237 = vmatprep.subr.mxu0 %v1302_v0 }
 0x1d9   :  { %1238 = vmatpush3.msra.mxu0 %v936_v55 }
 0x1da   :  { %1239 = vmatprep.subr.mxu0 %v1302_v0 }
 0x1db   :  { %1240 = vmatpush3.msra.mxu0 %v931_v57 }
 0x1dc   :  { %1241 = vmatprep.subr.mxu0 %v1302_v0 }
 0x1dd   :  { %1242 = vmatpush3.msra.mxu0 %v926_v58 }
 0x1de   :  { %1244 = vmatmul.mubr.msk.f32.vlgmr.msra.gmra.mxu0 %vm947_vm2, %v944_v53 }
 0x29e   :  { %v1017_v60 = vpop.f32.mrf.mxu0 }
 0x29f   :  { %v1018_v61 = vadd.f32 %v1017_v60, %v946_v59 }
 0x2a0   :  { %v1245_v62 = vpop.f32.mrf.mxu0 }
 0x2a1   :  { %1021 = vst [vmem:[#allocation6] sm:$0x1] %v1018_v61 }
 0x2a2   :  { %1286 = shalt.err (!%p1283_p9)
}
 0x2a3   :  { %1031 = dma.vmem_to_hbm [thread:$0]  %s1029_s12, 16, %s1502_s6, [#allocation5]  }
 0x2a4   :  { %1297 = dma.done.wait [#allocation5], 16  }
 0x2a5   :  { %1298 = vsyncadd [#allocation5], 4294967280 }
 0x2a6   :  { %1035 = vsyncpa [#allocation4], 1 }
 0x2a7   :  { %1036 = vsyncpa [#allocation5], 1 }

</bundles_post_ra>
